<compile_context>
chip_gen: v5e
topology: v5e:2x2
jax: 0.10.0
libtpu: 0.0.40
codegen_flags: <defaults>
</compile_context>

<pallas_src>
import functools
import math

import jax
import jax.numpy as jnp
from jax.experimental import pallas as pl
from jax.experimental.pallas import tpu as pltpu

_SUBLANE = 8
_LANE = 128
# Leave headroom under v7x's 64 MiB per-TensorCore VMEM (v5e/v6e have 128 MiB).
_DEFAULT_VMEM_BUDGET = 56 * 1024 * 1024
_VMEM_LIMIT_CAP = 60 * 1024 * 1024


def _round_up(x, m):
    return ((x + m - 1) // m) * m


def _vmem_limit(footprint_bytes):
    return int(min(max(int(1.25 * footprint_bytes), 16 << 20), _VMEM_LIMIT_CAP))


def _apply_activation(y, activation):
    # f32 epilogue (portable across v5e/v6e/v7x; EUP handles exp / sigmoid).
    if activation == "relu":
        return jnp.maximum(y, 0.0)
    if activation == "silu":
        return y * jax.nn.sigmoid(y)
    if activation == "softplus":
        # Stable softplus: max(y, 0) + log1p(exp(-|y|)).
        return jnp.maximum(y, 0.0) + jnp.log1p(jnp.exp(-jnp.abs(y)))
    raise NotImplementedError(activation)


def _fused_mlp_kernel(x_ref, *refs, activation, num_layers):
    """Fully fused MLP. refs = (w0, b0, ..., w_{L-1}, b_{L-1}, o_ref)."""
    o_ref = refs[-1]
    params = refs[:-1]

    h = x_ref[...]
    for layer in range(num_layers):
        w_ref = params[2 * layer]
        b_ref = params[2 * layer + 1]
        # MXU matmul in the (possibly bf16) weight dtype, f32 accumulation.
        y = jnp.dot(h.astype(w_ref.dtype), w_ref[...],
                    preferred_element_type=jnp.float32)
        y = y + b_ref[...]          # bias + activation epilogue in f32
        h = _apply_activation(y, activation)
    o_ref[...] = h.astype(o_ref.dtype)


def _single_layer_kernel(x_ref, w_ref, b_ref, o_ref, *, activation):
    """One (Linear + activation) layer; used by the weight-streaming fallback."""
    y = jnp.dot(x_ref[...].astype(w_ref.dtype), w_ref[...],
                preferred_element_type=jnp.float32)
    y = y + b_ref[...]
    o_ref[...] = _apply_activation(y, activation).astype(o_ref.dtype)


class MLPPallas:
    """Multilayer perceptron backbone (fused Pallas TPU implementation)."""

    def __init__(self, input_dim, hidden_dim, num_layers, activation="relu",
                 key=None, compute_dtype=jnp.bfloat16, out_dtype=None,
                 vmem_budget_bytes=_DEFAULT_VMEM_BUDGET):
        if activation not in ("relu", "silu", "softplus"):
            raise NotImplementedError(activation)
        self.input_dim = input_dim
        self.hidden_dim = hidden_dim
        self.num_layers = num_layers
        self.activation = activation
        self.compute_dtype = jnp.dtype(compute_dtype)
        self.out_dtype = None if out_dtype is None else jnp.dtype(out_dtype)
        self.vmem_budget_bytes = int(vmem_budget_bytes)

        # Lane-dense padded feature dims (multiples of 128).
        self._din_p = _round_up(input_dim, _LANE)
        self._h_p = _round_up(hidden_dim, _LANE)

        if key is None:
            key = jax.random.PRNGKey(0)

        self.weights = []       # padded, stored (in, out) == PyTorch (out, in).T
        self.biases = []        # padded, stored (1, out), f32
        self._ref_weights = []  # unpadded copies for the pure-JAX reference
        self._ref_biases = []

        last_dim, last_dim_p = input_dim, self._din_p
        for _ in range(num_layers):
            key, kw, kb = jax.random.split(key, 3)
            # nn.Linear-style init: U(-1/sqrt(fan_in), 1/sqrt(fan_in)).
            bound = 1.0 / math.sqrt(last_dim)
            w = jax.random.uniform(kw, (last_dim, hidden_dim), jnp.float32,
                                   minval=-bound, maxval=bound)
            b = jax.random.uniform(kb, (hidden_dim,), jnp.float32,
                                   minval=-bound, maxval=bound)
            # Zero-padded rows kill any contribution from padded activation
            # columns of the previous layer (correctness of the padding scheme).
            w_p = jnp.zeros((last_dim_p, self._h_p), jnp.float32)
            w_p = w_p.at[:last_dim, :hidden_dim].set(w)
            b_p = jnp.zeros((1, self._h_p), jnp.float32)
            b_p = b_p.at[0, :hidden_dim].set(b)
            self.weights.append(w_p.astype(self.compute_dtype))
            self.biases.append(b_p)
            self._ref_weights.append(w)
            self._ref_biases.append(b)
            last_dim, last_dim_p = hidden_dim, self._h_p

        self._param_bytes = sum(
            int(w.size) * w.dtype.itemsize + int(b.size) * b.dtype.itemsize
            for w, b in zip(self.weights, self.biases))

    # ---------- tiling / VMEM accounting ----------

    def _fused_footprint(self, tm, x_itemsize, out_itemsize):
        f = self._param_bytes                                 # weights, 1x (single-buffered)
        f += 2 * tm * self._din_p * x_itemsize                # double-buffered x tiles
        f += 2 * tm * self._h_p * out_itemsize                # double-buffered out tiles
        f += 3 * tm * max(self._din_p, self._h_p) * 4         # live f32 intermediates
        return f

    @staticmethod
    def _pick_tm(B, footprint_fn, budget):
        if B <= 128:
            return max(_SUBLANE, _round_up(B, _SUBLANE))
        # Prefer big tiles for HBM efficiency (~29% of roofline at 128-row tiles
        # vs ~85% at 512) but keep >= 4 grid steps so both v7x TensorCores get
        # batch work, and stay inside the VMEM budget.
        for tm in (512, 256, 128, 64, 32, 16, 8):
            if (tm <= 128 or B >= 4 * tm) and footprint_fn(tm) <= budget:
                return tm
        return _SUBLANE

    # ---------- forward paths ----------

    def __call__(self, x):
        assert x.shape[-1] == self.input_dim, x.shape
        lead_shape = x.shape[:-1]
        x2 = x.reshape(-1, self.input_dim)
        B = x2.shape[0]
        out_dtype = self.out_dtype if self.out_dtype is not None else x2.dtype

        fused_fp = lambda tm: self._fused_footprint(
            tm, x2.dtype.itemsize, jnp.dtype(out_dtype).itemsize)
        tm = self._pick_tm(B, fused_fp, self.vmem_budget_bytes)

        if fused_fp(tm) <= self.vmem_budget_bytes:
            y = self._forward_fused(x2, B, tm, out_dtype)
        else:
            # All-layer weights do not fit in VMEM simultaneously: stream one
            # (matmul + bias + activation) layer per pallas_call instead.
            y = self._forward_streaming(x2, B, out_dtype)
        return y.reshape(*lead_shape, self.hidden_dim)

    def _forward_fused(self, x2, B, tm, out_dtype):
        Bp = _round_up(B, tm)
        # Skip the wrapper-side pad / slice HBM round-trips when dims line up.
        if Bp == B and self._din_p == self.input_dim:
            x_in = x2
        else:
            x_in = jnp.pad(x2, ((0, Bp - B), (0, self._din_p - self.input_dim)))

        in_specs = [pl.BlockSpec((tm, self._din_p), lambda i: (i, 0))]
        params = []
        for w, b in zip(self.weights, self.biases):
            params.extend([w, b])
            # memory_space-only spec: whole array resident in VMEM for the whole
            # grid, SINGLE-buffered (no per-step re-DMA, no 2x pipeline buffers).
            in_specs.append(pl.BlockSpec(memory_space=pltpu.MemorySpace.VMEM))
            in_specs.append(pl.BlockSpec(memory_space=pltpu.MemorySpace.VMEM))

        footprint = self._fused_footprint(
            tm, x_in.dtype.itemsize, jnp.dtype(out_dtype).itemsize)
        kernel = functools.partial(_fused_mlp_kernel,
                                   activation=self.activation,
                                   num_layers=self.num_layers)
        out = pl.pallas_call(
            kernel,
            out_shape=jax.ShapeDtypeStruct((Bp, self._h_p), out_dtype),
            grid=(Bp // tm,),
            in_specs=in_specs,
            out_specs=pl.BlockSpec((tm, self._h_p), lambda i: (i, 0)),
            compiler_params=pltpu.CompilerParams(
                dimension_semantics=("parallel",),
                vmem_limit_bytes=_vmem_limit(footprint)),
        )(x_in, *params)

        if Bp != B or self._h_p != self.hidden_dim:
            out = out[:B, :self.hidden_dim]
        return out

    def _forward_streaming(self, x2, B, out_dtype):
        """Per-layer fallback: one pallas_call per layer; that layer's weights
        stay VMEM-resident while the activation streams through HBM."""
        def worst_footprint(tm):
            worst, kp = 0, self._din_p
            for w, b in zip(self.weights, self.biases):
                f = int(w.size) * w.dtype.itemsize + int(b.size) * b.dtype.itemsize
                f += 2 * tm * kp * 4 + 2 * tm * self._h_p * 4
                f += 3 * tm * max(kp, self._h_p) * 4
                worst = max(worst, f)
                kp = self._h_p
            return worst

        tm = self._pick_tm(B, worst_footprint, self.vmem_budget_bytes)
        Bp = _round_up(B, tm)
        if Bp == B and self._din_p == self.input_dim:
            h = x2
        else:
            h = jnp.pad(x2, ((0, Bp - B), (0, self._din_p - self.input_dim)))

        kernel = functools.partial(_single_layer_kernel, activation=self.activation)
        kp = self._din_p
        for layer, (w, b) in enumerate(zip(self.weights, self.biases)):
            last = layer == self.num_layers - 1
            o_dtype = out_dtype if last else jnp.float32  # f32 matches fused path
            footprint = (int(w.size) * w.dtype.itemsize
                         + int(b.size) * b.dtype.itemsize
                         + 2 * tm * kp * h.dtype.itemsize
                         + 2 * tm * self._h_p * jnp.dtype(o_dtype).itemsize
                         + 3 * tm * max(kp, self._h_p) * 4)
            # TODO(synk): if a single layer's weight exceeds the VMEM budget,
            # additionally tile its K/N axes with an f32 accumulator.
            h = pl.pallas_call(
                kernel,
                out_shape=jax.ShapeDtypeStruct((Bp, self._h_p), o_dtype),
                grid=(Bp // tm,),
                in_specs=[pl.BlockSpec((tm, kp), lambda i: (i, 0)),
                          pl.BlockSpec(memory_space=pltpu.MemorySpace.VMEM),
                          pl.BlockSpec(memory_space=pltpu.MemorySpace.VMEM)],
                out_specs=pl.BlockSpec((tm, self._h_p), lambda i: (i, 0)),
                compiler_params=pltpu.CompilerParams(
                    dimension_semantics=("parallel",),
                    vmem_limit_bytes=_vmem_limit(footprint)),
            )(h, w, b)
            kp = self._h_p

        if Bp != B or self._h_p != self.hidden_dim:
            h = h[:B, :self.hidden_dim]
        return h


def _reference_forward(mlp, x):
    """Plain-JAX reference (unpadded weights) for verification."""
    h = x.reshape(-1, mlp.input_dim)
    bf16 = mlp.compute_dtype == jnp.dtype(jnp.bfloat16)
    for w, b in zip(mlp._ref_weights, mlp._ref_biases):
        if bf16:
            y = jnp.dot(h.astype(jnp.bfloat16), w.astype(jnp.bfloat16),
                        preferred_element_type=jnp.float32) + b
        else:
            y = h @ w + b
        if mlp.activation == "relu":
            h = jnp.maximum(y, 0.0)
        elif mlp.activation == "silu":
            h = y * jax.nn.sigmoid(y)
        else:
            h = jax.nn.softplus(y)
    return h.reshape(*x.shape[:-1], mlp.hidden_dim)


if __name__ == "__main__":
    batch, input_dim, hidden_dim, num_layers = 8, 16, 32, 3
    x = jax.random.normal(jax.random.PRNGKey(0), (batch, input_dim), jnp.float32)

    # f32 compute path: exact vs the plain-JAX reference, all activations.
    for act in ("relu", "silu", "softplus"):
        mlp = MLPPallas(input_dim, hidden_dim, num_layers, activation=act,
                        key=jax.random.PRNGKey(42), compute_dtype=jnp.float32)
        out = jax.block_until_ready(mlp(x))
        ref = _reference_forward(mlp, x)
        assert out.shape == (batch, hidden_dim), out.shape
        assert jnp.allclose(out, ref, atol=1e-5, rtol=1e-5), f"mismatch ({act})"

    # Default bf16 MXU path (native on v5e/v6e/v7x): looser tolerance vs bf16 ref.
    mlp_bf16 = MLPPallas(input_dim, hidden_dim, num_layers, activation="silu",
                         key=jax.random.PRNGKey(42))
    out_bf16 = jax.block_until_ready(mlp_bf16(x))
    ref_bf16 = _reference_forward(mlp_bf16, x)
    assert out_bf16.shape == (batch, hidden_dim), out_bf16.shape
    assert jnp.allclose(out_bf16, ref_bf16, atol=2e-2, rtol=2e-2), "mismatch (bf16)"

    # Larger leading dims: exercises the multi-step batch grid + remainder pad.
    xb = jax.random.normal(jax.random.PRNGKey(1), (2, 150, input_dim), jnp.float32)
    mlp_big = MLPPallas(input_dim, hidden_dim, num_layers, activation="relu",
                        key=jax.random.PRNGKey(7), compute_dtype=jnp.float32)
    out_big = jax.block_until_ready(mlp_big(xb))
    ref_big = _reference_forward(mlp_big, xb)
    assert out_big.shape == (2, 150, hidden_dim), out_big.shape
    assert jnp.allclose(out_big, ref_big, atol=1e-5, rtol=1e-5), "mismatch (grid)"

    # Force the weight-streaming fallback (per-layer pallas_call) and verify it.
    mlp_stream = MLPPallas(input_dim, hidden_dim, num_layers, activation="relu",
                           key=jax.random.PRNGKey(7), compute_dtype=jnp.float32,
                           vmem_budget_bytes=1)
    out_s = jax.block_until_ready(mlp_stream(x))
    ref_s = _reference_forward(mlp_stream, x)
    assert jnp.allclose(out_s, ref_s, atol=1e-5, rtol=1e-5), "mismatch (stream)"

    print("KERNEL_OK")
</pallas_src>

<mosaic_0001>
module attributes {stable_mosaic.version = 11 : i64} {
  func.func @_fused_mlp_kernel(%arg0: i32, %arg1: memref<8x128xf32, #tpu.memory_space<vmem>>, %arg2: memref<128x128xf32, #tpu.memory_space<vmem>>, %arg3: memref<1x128xf32, #tpu.memory_space<vmem>>, %arg4: memref<128x128xf32, #tpu.memory_space<vmem>>, %arg5: memref<1x128xf32, #tpu.memory_space<vmem>>, %arg6: memref<128x128xf32, #tpu.memory_space<vmem>>, %arg7: memref<1x128xf32, #tpu.memory_space<vmem>>, %arg8: memref<8x128xf32, #tpu.memory_space<vmem>>) attributes {dimension_semantics = [#tpu.dimension_semantics<parallel>], iteration_bounds = array<i64: 1>, scalar_prefetch = 0 : i64, scratch_operands = 0 : i64, tpu.core_type = #tpu.core_type<tc>, window_params = [{transform_indices = @transform_0, window_bounds = array<i64: 8, 128>}, {pipeline_mode = #tpu.pipeline_mode<synchronous>, transform_indices = @transform_1, window_bounds = array<i64: 128, 128>}, {pipeline_mode = #tpu.pipeline_mode<synchronous>, transform_indices = @transform_2, window_bounds = array<i64: 1, 128>}, {pipeline_mode = #tpu.pipeline_mode<synchronous>, transform_indices = @transform_3, window_bounds = array<i64: 128, 128>}, {pipeline_mode = #tpu.pipeline_mode<synchronous>, transform_indices = @transform_4, window_bounds = array<i64: 1, 128>}, {pipeline_mode = #tpu.pipeline_mode<synchronous>, transform_indices = @transform_5, window_bounds = array<i64: 128, 128>}, {pipeline_mode = #tpu.pipeline_mode<synchronous>, transform_indices = @transform_6, window_bounds = array<i64: 1, 128>}, {transform_indices = @transform_7, window_bounds = array<i64: 8, 128>}]} {
    %c0 = arith.constant 0 : index
    %c0_0 = arith.constant 0 : index
    %0 = vector.load %arg1[%c0, %c0_0] : memref<8x128xf32, #tpu.memory_space<vmem>>, vector<8x128xf32>
    %c0_1 = arith.constant 0 : index
    %c0_2 = arith.constant 0 : index
    %1 = vector.load %arg2[%c0_1, %c0_2] : memref<128x128xf32, #tpu.memory_space<vmem>>, vector<128x128xf32>
    %cst = arith.constant dense<0.000000e+00> : vector<8x128xf32>
    %2 = tpu.matmul %0, %1, %cst {dimension_numbers = #tpu.dot_dimension_numbers<[1], [0], [0], [1], [0, 0, 1, 1], [], []>} : vector<8x128xf32>, vector<128x128xf32>, vector<8x128xf32> -> vector<8x128xf32>
    %c0_3 = arith.constant 0 : index
    %c0_4 = arith.constant 0 : index
    %3 = vector.load %arg3[%c0_3, %c0_4] : memref<1x128xf32, #tpu.memory_space<vmem>>, vector<1x128xf32>
    %4 = vector.broadcast %3 : vector<1x128xf32> to vector<8x128xf32>
    %5 = arith.addf %2, %4 : vector<8x128xf32>
    %cst_5 = arith.constant 0.000000e+00 : f32
    %6 = vector.broadcast %cst_5 : f32 to vector<8x128xf32>
    %7 = arith.maximumf %5, %6 : vector<8x128xf32>
    %c0_6 = arith.constant 0 : index
    %c0_7 = arith.constant 0 : index
    %8 = vector.load %arg4[%c0_6, %c0_7] : memref<128x128xf32, #tpu.memory_space<vmem>>, vector<128x128xf32>
    %cst_8 = arith.constant dense<0.000000e+00> : vector<8x128xf32>
    %9 = tpu.matmul %7, %8, %cst_8 {dimension_numbers = #tpu.dot_dimension_numbers<[1], [0], [0], [1], [0, 0, 1, 1], [], []>} : vector<8x128xf32>, vector<128x128xf32>, vector<8x128xf32> -> vector<8x128xf32>
    %c0_9 = arith.constant 0 : index
    %c0_10 = arith.constant 0 : index
    %10 = vector.load %arg5[%c0_9, %c0_10] : memref<1x128xf32, #tpu.memory_space<vmem>>, vector<1x128xf32>
    %11 = vector.broadcast %10 : vector<1x128xf32> to vector<8x128xf32>
    %12 = arith.addf %9, %11 : vector<8x128xf32>
    %cst_11 = arith.constant 0.000000e+00 : f32
    %13 = vector.broadcast %cst_11 : f32 to vector<8x128xf32>
    %14 = arith.maximumf %12, %13 : vector<8x128xf32>
    %c0_12 = arith.constant 0 : index
    %c0_13 = arith.constant 0 : index
    %15 = vector.load %arg6[%c0_12, %c0_13] : memref<128x128xf32, #tpu.memory_space<vmem>>, vector<128x128xf32>
    %cst_14 = arith.constant dense<0.000000e+00> : vector<8x128xf32>
    %16 = tpu.matmul %14, %15, %cst_14 {dimension_numbers = #tpu.dot_dimension_numbers<[1], [0], [0], [1], [0, 0, 1, 1], [], []>} : vector<8x128xf32>, vector<128x128xf32>, vector<8x128xf32> -> vector<8x128xf32>
    %c0_15 = arith.constant 0 : index
    %c0_16 = arith.constant 0 : index
    %17 = vector.load %arg7[%c0_15, %c0_16] : memref<1x128xf32, #tpu.memory_space<vmem>>, vector<1x128xf32>
    %18 = vector.broadcast %17 : vector<1x128xf32> to vector<8x128xf32>
    %19 = arith.addf %16, %18 : vector<8x128xf32>
    %cst_17 = arith.constant 0.000000e+00 : f32
    %20 = vector.broadcast %cst_17 : f32 to vector<8x128xf32>
    %21 = arith.maximumf %19, %20 : vector<8x128xf32>
    %c0_18 = arith.constant 0 : index
    %c0_19 = arith.constant 0 : index
    %22 = vector.load %arg8[%c0_18, %c0_19] : memref<8x128xf32, #tpu.memory_space<vmem>>, vector<8x128xf32>
    tpu.vector_store %arg8[%c0_18, %c0_19], %21 {strides = array<i32>} : memref<8x128xf32, #tpu.memory_space<vmem>>, vector<8x128xf32>,
    return
  }
  func.func @transform_0(%arg0: i32) -> (i32, i32) {
    %c0_i32 = arith.constant 0 : i32
    %c0_i32_0 = arith.constant 0 : i32
    return %arg0, %c0_i32 : i32, i32
  }
  func.func @transform_1(%arg0: i32) -> (i32, i32) {
    %c0_i32 = arith.constant 0 : i32
    %c0_i32_0 = arith.constant 0 : i32
    %c0_i32_1 = arith.constant 0 : i32
    return %c0_i32, %c0_i32_0 : i32, i32
  }
  func.func @transform_2(%arg0: i32) -> (i32, i32) {
    %c0_i32 = arith.constant 0 : i32
    %c0_i32_0 = arith.constant 0 : i32
    %c0_i32_1 = arith.constant 0 : i32
    return %c0_i32, %c0_i32_0 : i32, i32
  }
  func.func @transform_3(%arg0: i32) -> (i32, i32) {
    %c0_i32 = arith.constant 0 : i32
    %c0_i32_0 = arith.constant 0 : i32
    %c0_i32_1 = arith.constant 0 : i32
    return %c0_i32, %c0_i32_0 : i32, i32
  }
  func.func @transform_4(%arg0: i32) -> (i32, i32) {
    %c0_i32 = arith.constant 0 : i32
    %c0_i32_0 = arith.constant 0 : i32
    %c0_i32_1 = arith.constant 0 : i32
    return %c0_i32, %c0_i32_0 : i32, i32
  }
  func.func @transform_5(%arg0: i32) -> (i32, i32) {
    %c0_i32 = arith.constant 0 : i32
    %c0_i32_0 = arith.constant 0 : i32
    %c0_i32_1 = arith.constant 0 : i32
    return %c0_i32, %c0_i32_0 : i32, i32
  }
  func.func @transform_6(%arg0: i32) -> (i32, i32) {
    %c0_i32 = arith.constant 0 : i32
    %c0_i32_0 = arith.constant 0 : i32
    %c0_i32_1 = arith.constant 0 : i32
    return %c0_i32, %c0_i32_0 : i32, i32
  }
  func.func @transform_7(%arg0: i32) -> (i32, i32) {
    %c0_i32 = arith.constant 0 : i32
    %c0_i32_0 = arith.constant 0 : i32
    return %arg0, %c0_i32 : i32, i32
  }
}

</mosaic_0001>

<bundles_post_ra>
// kernel: tpu_custom_call.1
= control target key start
LH: loop header
LB: loop body
LE: loop exit
PB: predicated region body
PF: predicated region fallthrough
CT: control target
= control target key end

     0   :  { %12 = vsyncpa [#allocation3], 0  ;;  %s441_s0 = inlined_call_operand.hbm [shape: f32[8,128], index: 0, kind: input, shape index: {}]   ;;  %s442_s1 = inlined_call_operand.hbm [shape: f32[128,128], index: 1, kind: input, shape index: {}]   ;;  %s443_s2 = inlined_call_operand.vmem [shape: f32[1,128], index: 2, kind: input, shape index: {}]   ;;  %s444_s3 = inlined_call_operand.hbm [shape: f32[128,128], index: 3, kind: input, shape index: {}]   ;;  %s445_s4 = inlined_call_operand.vmem [shape: f32[1,128], index: 4, kind: input, shape index: {}]   ;;  %s446_s5 = inlined_call_operand.hbm [shape: f32[128,128], index: 5, kind: input, shape index: {}]   ;;  %s447_s6 = inlined_call_operand.vmem [shape: f32[1,128], index: 6, kind: input, shape index: {}]   ;;  %s448_s7 = inlined_call_operand.hbm [shape: f32[8,128], index: 7, kind: output, shape index: {}]  }
   0x1   :  { %13 = vsyncpa [#allocation6], 0 }
   0x2   :  { %14 = vsyncpa [#allocation9], 0  ;;  %s31_s26 = sshll.u32 %s442_s1, 4  ;;  %s32_s26 = int_to_ptr.hbm [resolvable:$true] %s31_s26 }
   0x3   :  { %15 = vsyncpa [#allocation4], 0  ;;  %s370_s27 = smov [#allocation5]   ;;  %s21_s8 = sshll.u32 %s441_s0, 4  ;;  %s22_s8 = int_to_ptr.hbm [resolvable:$true] %s21_s8 }
   0x4   :  { %s33_s28 = sshll.u32 %s370_s27, 4  ;;  %s371_s9 = smov 128   ;;  %s34_s28 = int_to_ptr.vmem [resolvable:$true] %s33_s28 }
   0x5   :  { %s372_s10 = smov 8   ;;  %s373_s11 = smov [#allocation2]  }
   0x6   :  { %39 = dma.hbm_to_vmem [thread:$0]  %s32_s26, 2048, %s34_s28, [#allocation6], %s371_s9, %s371_s9, %s372_s10  }
   0x7   :  { %s23_s12 = sshll.u32 %s373_s11, 4  ;;  %s46_s15 = sshll.u32 %s444_s3, 4  ;;  %s24_s12 = int_to_ptr.vmem [resolvable:$true] %s23_s12  ;;  %s47_s15 = int_to_ptr.hbm [resolvable:$true] %s46_s15 }
   0x8   :  { %26 = dma.hbm_to_vmem [thread:$0]  %s22_s8, 128, %s24_s12, [#allocation3]  }
   0x9   :  { %s61_s17 = sshll.u32 %s446_s5, 4  ;;  %s374_s18 = smov [#allocation7]   ;;  %s62_s17 = int_to_ptr.hbm [resolvable:$true] %s61_s17 }
   0xa   :  { %s48_s19 = sshll.u32 %s374_s18, 4  ;;  %s375_s0 = smov [#allocation8]   ;;  %s49_s19 = int_to_ptr.vmem [resolvable:$true] %s48_s19 }
   0xb   :  { %54 = dma.hbm_to_vmem [thread:$0]  %s47_s15, 2048, %s49_s19, [#allocation6], %s371_s9, %s371_s9, %s372_s10  }
   0xc   :  { %s63_s20 = sshll.u32 %s375_s0, 4  ;;  %s64_s20 = int_to_ptr.vmem [resolvable:$true] %s63_s20 }
   0xd   :  { %69 = dma.hbm_to_vmem [thread:$0]  %s62_s17, 2048, %s64_s20, [#allocation9], %s371_s9, %s371_s9, %s372_s10  }
   0xe   :  { %362 = dma.done.wait [#allocation3], 128  }
   0xf   :  { %363 = vsyncadd [#allocation3], 4294967168 }
  0x10   :  { %364 = dma.done.wait [#allocation6], 4096  }
  0x11   :  { %365 = vsyncadd [#allocation6], 4294963200 }
  0x12   :  { %366 = dma.done.wait [#allocation9], 2048  }
  0x13   :  { %367 = vsyncadd [#allocation9], 4294965248  ;;  %v104_v0 = vld [vmem:[#allocation5 + $0x78] sm:$0xff]  ;;  %v103_v1 = vld [vmem:[#allocation5 + $0x70] sm:$0xff]  ;;  %s376_s24 = smov [#allocation10]   ;;  %s220_s28 = sshll.u32 %s448_s7, 4  ;;  %s221_s28 = int_to_ptr.hbm [resolvable:$true] %s220_s28 }
  0x14   :  { %109 = vmatpush.msra.mxu0 %v104_v0  ;;  %v102_v2 = vld [vmem:[#allocation5 + $0x68] sm:$0xff]  ;;  %v101_v3 = vld [vmem:[#allocation5 + $0x60] sm:$0xff]  ;;  %v145_v4 = vld [vmem:[#allocation7 + $0x78] sm:$0xff]  ;;  %s218_s25 = sshll.u32 %s376_s24, 4  ;;  %s219_s25 = int_to_ptr.vmem [resolvable:$true] %s218_s25 }
  0x15   :  { %v100_v5 = vld [vmem:[#allocation5 + $0x58] sm:$0xff]  ;;  %150 = vmatpush.msra.mxu1 %v145_v4  ;;  %v144_v6 = vld [vmem:[#allocation7 + $0x70] sm:$0xff]  ;;  %v143_v7 = vld [vmem:[#allocation7 + $0x68] sm:$0xff] }
  0x16   :  { %110 = vmatpush.msra.mxu0 %v103_v1  ;;  %v99_v8 = vld [vmem:[#allocation5 + $0x50] sm:$0xff]  ;;  %v142_v9 = vld [vmem:[#allocation7 + $0x60] sm:$0xff]  ;;  %v98_v10 = vld [vmem:[#allocation5 + $0x48] sm:$0xff] }
  0x17   :  { %151 = vmatpush.msra.mxu1 %v144_v6  ;;  %v141_v11 = vld [vmem:[#allocation7 + $0x58] sm:$0xff]  ;;  %v97_v12 = vld [vmem:[#allocation5 + $0x40] sm:$0xff]  ;;  %v140_v13 = vld [vmem:[#allocation7 + $0x50] sm:$0xff] }
  0x18   :  { %111 = vmatpush.msra.mxu0 %v102_v2  ;;  %v96_v14 = vld [vmem:[#allocation5 + $0x38] sm:$0xff]  ;;  %v139_v15 = vld [vmem:[#allocation7 + $0x48] sm:$0xff]  ;;  %v95_v16 = vld [vmem:[#allocation5 + $0x30] sm:$0xff] }
  0x19   :  { %152 = vmatpush.msra.mxu1 %v143_v7  ;;  %v138_v17 = vld [vmem:[#allocation7 + $0x40] sm:$0xff]  ;;  %v94_v18 = vld [vmem:[#allocation5 + $0x28] sm:$0xff]  ;;  %v137_v19 = vld [vmem:[#allocation7 + $0x38] sm:$0xff] }
  0x1a   :  { %112 = vmatpush.msra.mxu0 %v101_v3  ;;  %v93_v20 = vld [vmem:[#allocation5 + $0x20] sm:$0xff]  ;;  %v136_v21 = vld [vmem:[#allocation7 + $0x30] sm:$0xff]  ;;  %v92_v22 = vld [vmem:[#allocation5 + $0x18] sm:$0xff] }
  0x1b   :  { %153 = vmatpush.msra.mxu1 %v142_v9  ;;  %v135_v23 = vld [vmem:[#allocation7 + $0x28] sm:$0xff]  ;;  %v91_v24 = vld [vmem:[#allocation5 + $0x10] sm:$0xff]  ;;  %v134_v25 = vld [vmem:[#allocation7 + $0x20] sm:$0xff] }
  0x1c   :  { %113 = vmatpush.msra.mxu0 %v100_v5  ;;  %v90_v26 = vld [vmem:[#allocation5 + $0x8] sm:$0xff]  ;;  %v133_v27 = vld [vmem:[#allocation7 + $0x18] sm:$0xff]  ;;  %v89_v28 = vld [vmem:[#allocation5] sm:$0xff] }
  0x1d   :  { %154 = vmatpush.msra.mxu1 %v141_v11  ;;  %v88_v29 = vld [vmem:[#allocation2] sm:$0xff]  ;;  %v132_v30 = vld [vmem:[#allocation7 + $0x10] sm:$0xff]  ;;  %v131_v31 = vld [vmem:[#allocation7 + $0x8] sm:$0xff] }
  0x1e   :  { %114 = vmatpush.msra.mxu0 %v99_v8  ;;  %v130_v32 = vld [vmem:[#allocation7] sm:$0xff]  ;;  %v186_v33 = vld [vmem:[#allocation8 + $0x78] sm:$0xff]  ;;  %v185_v34 = vld [vmem:[#allocation8 + $0x70] sm:$0xff] }
  0x1f   :  { %155 = vmatpush.msra.mxu1 %v140_v13  ;;  %191 = vmatpush.msra.mxu2 %v186_v33  ;;  %v184_v35 = vld [vmem:[#allocation8 + $0x68] sm:$0xff]  ;;  %v183_v36 = vld [vmem:[#allocation8 + $0x60] sm:$0xff]  ;;  %v182_v37 = vld [vmem:[#allocation8 + $0x58] sm:$0xff] }
  0x20   :  { %115 = vmatpush.msra.mxu0 %v98_v10  ;;  %v181_v38 = vld [vmem:[#allocation8 + $0x50] sm:$0xff]  ;;  %v180_v39 = vld [vmem:[#allocation8 + $0x48] sm:$0xff]  ;;  %v179_v40 = vld [vmem:[#allocation8 + $0x40] sm:$0xff] }
  0x21   :  { %156 = vmatpush.msra.mxu1 %v139_v15  ;;  %192 = vmatpush.msra.mxu2 %v185_v34  ;;  %v178_v41 = vld [vmem:[#allocation8 + $0x38] sm:$0xff]  ;;  %v177_v42 = vld [vmem:[#allocation8 + $0x30] sm:$0xff]  ;;  %v176_v43 = vld [vmem:[#allocation8 + $0x28] sm:$0xff] }
  0x22   :  { %116 = vmatpush.msra.mxu0 %v97_v12  ;;  %v175_v44 = vld [vmem:[#allocation8 + $0x20] sm:$0xff]  ;;  %v174_v45 = vld [vmem:[#allocation8 + $0x18] sm:$0xff]  ;;  %v173_v50 = vld [vmem:[#allocation8 + $0x10] sm:$0xff] }
  0x23   :  { %157 = vmatpush.msra.mxu1 %v138_v17  ;;  %193 = vmatpush.msra.mxu2 %v184_v35  ;;  %v239_v46 = vld [vmem:[%s443_s2] ss:$0 sm:$0xff]  ;;  %v172_v51 = vld [vmem:[#allocation8 + $0x8] sm:$0xff]  ;;  %v171_v52 = vld [vmem:[#allocation8] sm:$0xff] }
  0x24   :  { %117 = vmatpush.msra.mxu0 %v96_v14  ;;  %v240_v53 = vld [vmem:[%s445_s4] ss:$0 sm:$0xff] }
  0x25   :  { %158 = vmatpush.msra.mxu1 %v137_v19  ;;  %194 = vmatpush.msra.mxu2 %v183_v36  ;;  %v241_v57 = vld [vmem:[%s447_s6] ss:$0 sm:$0xff] }
  0x26   :  { %118 = vmatpush.msra.mxu0 %v95_v16 }
  0x27   :  { %159 = vmatpush.msra.mxu1 %v136_v21  ;;  %195 = vmatpush.msra.mxu2 %v182_v37 }
  0x28   :  { %119 = vmatpush.msra.mxu0 %v94_v18 }
  0x29   :  { %160 = vmatpush.msra.mxu1 %v135_v23  ;;  %196 = vmatpush.msra.mxu2 %v181_v38 }
  0x2a   :  { %120 = vmatpush.msra.mxu0 %v93_v20 }
  0x2b   :  { %161 = vmatpush.msra.mxu1 %v134_v25  ;;  %197 = vmatpush.msra.mxu2 %v180_v39 }
  0x2c   :  { %121 = vmatpush.msra.mxu0 %v92_v22 }
  0x2d   :  { %162 = vmatpush.msra.mxu1 %v133_v27  ;;  %198 = vmatpush.msra.mxu2 %v179_v40 }
  0x2e   :  { %122 = vmatpush.msra.mxu0 %v91_v24 }
  0x2f   :  { %163 = vmatpush.msra.mxu1 %v132_v30  ;;  %199 = vmatpush.msra.mxu2 %v178_v41 }
  0x30   :  { %123 = vmatpush.msra.mxu0 %v90_v26 }
  0x31   :  { %164 = vmatpush.msra.mxu1 %v131_v31  ;;  %200 = vmatpush.msra.mxu2 %v177_v42 }
  0x32   :  { %124 = vmatpush.msra.mxu0 %v89_v28 }
  0x33   :  { %125 = vmatmul.f32.vlgmr.msra.gmra.mxu0 %v88_v29  ;;  %165 = vmatpush.msra.mxu1 %v130_v32 }
  0x34   :  { %201 = vmatpush.msra.mxu2 %v176_v43 }
  0x36   :  { %202 = vmatpush.msra.mxu2 %v175_v44 }
  0x38   :  { %203 = vmatpush.msra.mxu2 %v174_v45 }
  0x3a   :  { %204 = vmatpush.msra.mxu2 %v173_v50 }
  0x3c   :  { %205 = vmatpush.msra.mxu2 %v172_v51 }
  0x3e   :  { %206 = vmatpush.msra.mxu2 %v171_v52 }
  0xb0   :  { %v126_v47 = vpop.f32.mrf.mxu0 }
  0xb1   :  { %v127_v48 = vadd.f32 %v239_v46, %v126_v47 }
  0xb3   :  { %v129_v49 = vmax.f32 %v127_v48, 0.0 }
  0xb5   :  { %166 = vmatmul.f32.vlgmr.msra.gmra.mxu1 %v129_v49 }
 0x132   :  { %v167_v54 = vpop.f32.mrf.mxu1 }
 0x133   :  { %v168_v55 = vadd.f32 %v240_v53, %v167_v54 }
 0x135   :  { %v170_v56 = vmax.f32 %v168_v55, 0.0 }
 0x137   :  { %207 = vmatmul.f32.vlgmr.msra.gmra.mxu2 %v170_v56 }
 0x1ba   :  { %v208_v58 = vpop.f32.mrf.mxu2 }
 0x1bb   :  { %v209_v59 = vadd.f32 %v241_v57, %v208_v58 }
 0x1bd   :  { %v211_v60 = vmax.f32 %v209_v59, 0.0 }
 0x1bf   :  { %212 = vst [vmem:[#allocation10] sm:$0xff] %v211_v60 }
 0x1c0   :  { %223 = dma.vmem_to_hbm [thread:$0]  %s219_s25, 128, %s221_s28, [#allocation4]  }
 0x1c1   :  { %368 = dma.done.wait [#allocation4], 128  }
 0x1c2   :  { %369 = vsyncadd [#allocation4], 4294967168 }
 0x1c3   :  { %228 = vsyncpa [#allocation3], 1 }
 0x1c4   :  { %229 = vsyncpa [#allocation6], 1 }
 0x1c5   :  { %230 = vsyncpa [#allocation9], 1 }
 0x1c6   :  { %231 = vsyncpa [#allocation4], 1 }

</bundles_post_ra>
